<compile_context>
chip_gen: v7x
topology: tpu7x:2x2x1
jax: 0.10.0
libtpu: 0.0.40
codegen_flags: <defaults>
</compile_context>

<pallas_src>
import jax
import jax.numpy as jnp
from jax import lax
from jax.experimental import pallas as pl
from jax.experimental.pallas import tpu as pltpu


def _round_up(n, m):
    return ((n + m - 1) // m) * m


def mlp_kernel(x_ref, w1_ref, b1_ref, w2_ref, b2_ref, w3_ref, b3_ref, o_ref):
    # x_ref : (TB, D) bf16   -- batch on sublanes of the input block
    # w1    : (H, D)  bf16,  b1: (H, 1) f32
    # w2    : (H, H)  bf16,  b2: (H, 1) f32
    # w3    : (H, 1)  f32,   b3: (1, 1) f32
    # o_ref : (1, TB) f32    -- lane-dense output row
    x = x_ref[...]

    # fc1: W1 @ x^T done by contracting both operands on D — the operand transpose
    # rides the MXU feed path instead of an XLA HBM pass.  Result (H, TB), f32 acc.
    h1 = lax.dot_general(w1_ref[...], x, (((1,), (1,)), ((), ())),
                         preferred_element_type=jnp.float32) + b1_ref[...]
    h1 = jnp.maximum(h1, 0.0)                                    # (H, TB) ReLU, f32

    # fc2: (H, H) @ (H, TB) -> (H, TB); bf16 operands, f32 accumulate.
    h2 = jnp.dot(w2_ref[...], h1.astype(jnp.bfloat16),
                 preferred_element_type=jnp.float32) + b2_ref[...]
    h2 = jnp.maximum(h2, 0.0)                                    # (H, TB) ReLU, f32

    # fc3 (out_features = 1): VPU multiply + XLU sublane reduce instead of a padded
    # N=1 MXU matmul.  All in f32.
    z = jnp.sum(h2 * w3_ref[...], axis=0, keepdims=True) + b3_ref[...]   # (1, TB)
    o_ref[...] = jax.nn.sigmoid(z).astype(o_ref.dtype)          # lane-dense store


def mlp_forward(x, params, *, block_b=8192):
    """x: (B, F1, F2) float32 (or bf16). Returns (B, 1) float32."""
    B = x.shape[0]
    D = x.shape[1] * x.shape[2]
    w1, b1, w2, b2, w3, b3 = params

    # bf16 matmul operands (bandwidth win); biases / fc3 weight stay f32.
    x2d = x.reshape(B, D).astype(jnp.bfloat16)
    w1b = w1.astype(jnp.bfloat16)
    w2b = w2.astype(jnp.bfloat16)

    # Batch tile: big (multiple of 128) to amortize per-step overhead, but split so
    # large batches give at least 2 grid steps (v7x has 2 TensorCores on the
    # "parallel" axis).  Ragged final block is handled by Pallas masking.
    tb = min(block_b, max(128, _round_up(pl.cdiv(B, 2), 128)))
    nb = pl.cdiv(B, tb)

    def resident(a):
        # Constant block index -> stays VMEM-resident across grid steps (no re-DMA).
        return pl.BlockSpec(a.shape, lambda i, _nd=a.ndim: (0,) * _nd)

    out = pl.pallas_call(
        mlp_kernel,
        out_shape=jax.ShapeDtypeStruct((1, B), jnp.float32),
        grid=(nb,),
        in_specs=[
            pl.BlockSpec((tb, D), lambda i: (i, 0)),             # contiguous batch tile
            resident(w1b), resident(b1),
            resident(w2b), resident(b2),
            resident(w3), resident(b3),
        ],
        out_specs=pl.BlockSpec((1, tb), lambda i: (0, i)),       # lane-dense output
        compiler_params=pltpu.CompilerParams(
            dimension_semantics=("parallel",),
            vmem_limit_bytes=32 * 1024 * 1024),
    )(x2d, w1b, b1, w2b, b2, w3, b3)

    # (1, B) -> (B, 1) is a pure row-major reinterpretation.
    return out.reshape(B, 1)


def init_params(key, input_size, hidden_size):
    """PyTorch-Linear-style uniform init. Weights stored (out_features, in_features),
    biases as columns; fc3 weight stored as an (H, 1) column for the in-kernel reduce."""
    ks = jax.random.split(key, 6)

    def linear(kw, kb, fan_in, fan_out):
        bound = 1.0 / (fan_in ** 0.5)
        w = jax.random.uniform(kw, (fan_out, fan_in), jnp.float32, -bound, bound)
        b = jax.random.uniform(kb, (fan_out, 1), jnp.float32, -bound, bound)
        return w, b

    w1, b1 = linear(ks[0], ks[1], input_size, hidden_size)
    w2, b2 = linear(ks[2], ks[3], hidden_size, hidden_size)
    w3_row, b3 = linear(ks[4], ks[5], hidden_size, 1)            # (1, H), (1, 1)
    w3 = w3_row.T                                                # (H, 1) column
    return (w1, b1, w2, b2, w3, b3)


def _reference(x, params):
    """f32 reference matching the PyTorch module."""
    B = x.shape[0]
    D = x.shape[1] * x.shape[2]
    w1, b1, w2, b2, w3, b3 = params
    x2d = x.reshape(B, D).astype(jnp.float32)
    h1 = jnp.maximum(x2d @ w1.T + b1.T, 0.0)
    h2 = jnp.maximum(h1 @ w2.T + b2.T, 0.0)
    return jax.nn.sigmoid(h2 @ w3 + b3)


if __name__ == "__main__":
    key = jax.random.PRNGKey(0)
    k_x, k_x2, k_p = jax.random.split(key, 3)

    B, F1, F2 = 2, 4, 8                  # x.reshape -> (B, 32)
    input_size = F1 * F2
    hidden_size = 32

    params = init_params(k_p, input_size, hidden_size)

    # bf16 matmul operands -> loosened tolerance vs. the f32 reference (expected).
    TOL = 2e-2

    # Small case (single grid step, ragged partial block).
    x = jax.random.normal(k_x, (B, F1, F2), jnp.float32)
    out = jax.block_until_ready(mlp_forward(x, params))
    ref = _reference(x, params)
    assert out.shape == (B, 1)
    assert jnp.allclose(out, ref, atol=TOL, rtol=TOL)

    # Larger batch exercising the multi-block "parallel" path with a ragged tail.
    B2 = 1050
    x2 = jax.random.normal(k_x2, (B2, F1, F2), jnp.float32)
    out2 = jax.block_until_ready(mlp_forward(x2, params))
    ref2 = _reference(x2, params)
    assert out2.shape == (B2, 1)
    assert jnp.allclose(out2, ref2, atol=TOL, rtol=TOL)

    print("KERNEL_OK")
</pallas_src>

<mosaic_0001>
module attributes {stable_mosaic.version = 11 : i64} {
  func.func @mlp_kernel(%arg0: i32, %arg1: memref<128x32xbf16, #tpu.memory_space<vmem>>, %arg2: memref<32x32xbf16, #tpu.memory_space<vmem>>, %arg3: memref<32x1xf32, #tpu.memory_space<vmem>>, %arg4: memref<32x32xbf16, #tpu.memory_space<vmem>>, %arg5: memref<32x1xf32, #tpu.memory_space<vmem>>, %arg6: memref<32x1xf32, #tpu.memory_space<vmem>>, %arg7: memref<1x1xf32, #tpu.memory_space<vmem>>, %arg8: memref<1x128xf32, #tpu.memory_space<vmem>>) attributes {dimension_semantics = [#tpu.dimension_semantics<parallel>], iteration_bounds = array<i64: 1>, scalar_prefetch = 0 : i64, scratch_operands = 0 : i64, tpu.core_type = #tpu.core_type<tc>, window_params = [{transform_indices = @transform_0, window_bounds = array<i64: 128, 32>}, {pipeline_mode = #tpu.pipeline_mode<synchronous>, transform_indices = @transform_1, window_bounds = array<i64: 32, 32>}, {pipeline_mode = #tpu.pipeline_mode<synchronous>, transform_indices = @transform_2, window_bounds = array<i64: 32, 1>}, {pipeline_mode = #tpu.pipeline_mode<synchronous>, transform_indices = @transform_3, window_bounds = array<i64: 32, 32>}, {pipeline_mode = #tpu.pipeline_mode<synchronous>, transform_indices = @transform_4, window_bounds = array<i64: 32, 1>}, {pipeline_mode = #tpu.pipeline_mode<synchronous>, transform_indices = @transform_5, window_bounds = array<i64: 32, 1>}, {pipeline_mode = #tpu.pipeline_mode<synchronous>, transform_indices = @transform_6, window_bounds = array<i64: 1, 1>}, {transform_indices = @transform_7, window_bounds = array<i64: 1, 128>}]} {
    %c0 = arith.constant 0 : index
    %c0_0 = arith.constant 0 : index
    %0 = vector.load %arg1[%c0, %c0_0] : memref<128x32xbf16, #tpu.memory_space<vmem>>, vector<128x32xbf16>
    %c0_1 = arith.constant 0 : index
    %c0_2 = arith.constant 0 : index
    %1 = vector.load %arg2[%c0_1, %c0_2] : memref<32x32xbf16, #tpu.memory_space<vmem>>, vector<32x32xbf16>
    %cst = arith.constant dense<0.000000e+00> : vector<32x128xf32>
    %2 = tpu.matmul %1, %0, %cst {dimension_numbers = #tpu.dot_dimension_numbers<[1], [1], [0], [0], [0, 0, 1, 0], [], []>} : vector<32x32xbf16>, vector<128x32xbf16>, vector<32x128xf32> -> vector<32x128xf32>
    %c0_3 = arith.constant 0 : index
    %c0_4 = arith.constant 0 : index
    %3 = vector.load %arg3[%c0_3, %c0_4] : memref<32x1xf32, #tpu.memory_space<vmem>>, vector<32x1xf32>
    %4 = vector.broadcast %3 : vector<32x1xf32> to vector<32x128xf32>
    %5 = arith.addf %2, %4 : vector<32x128xf32>
    %cst_5 = arith.constant 0.000000e+00 : f32
    %6 = vector.broadcast %cst_5 : f32 to vector<32x128xf32>
    %7 = arith.maximumf %5, %6 : vector<32x128xf32>
    %c0_6 = arith.constant 0 : index
    %c0_7 = arith.constant 0 : index
    %8 = vector.load %arg4[%c0_6, %c0_7] : memref<32x32xbf16, #tpu.memory_space<vmem>>, vector<32x32xbf16>
    %9 = arith.truncf %7 : vector<32x128xf32> to vector<32x128xbf16>
    %cst_8 = arith.constant dense<0.000000e+00> : vector<32x128xf32>
    %10 = tpu.matmul %8, %9, %cst_8 {dimension_numbers = #tpu.dot_dimension_numbers<[1], [0], [0], [1], [0, 0, 1, 1], [], []>} : vector<32x32xbf16>, vector<32x128xbf16>, vector<32x128xf32> -> vector<32x128xf32>
    %c0_9 = arith.constant 0 : index
    %c0_10 = arith.constant 0 : index
    %11 = vector.load %arg5[%c0_9, %c0_10] : memref<32x1xf32, #tpu.memory_space<vmem>>, vector<32x1xf32>
    %12 = vector.broadcast %11 : vector<32x1xf32> to vector<32x128xf32>
    %13 = arith.addf %10, %12 : vector<32x128xf32>
    %cst_11 = arith.constant 0.000000e+00 : f32
    %14 = vector.broadcast %cst_11 : f32 to vector<32x128xf32>
    %15 = arith.maximumf %13, %14 : vector<32x128xf32>
    %c0_12 = arith.constant 0 : index
    %c0_13 = arith.constant 0 : index
    %16 = vector.load %arg6[%c0_12, %c0_13] : memref<32x1xf32, #tpu.memory_space<vmem>>, vector<32x1xf32>
    %17 = vector.broadcast %16 : vector<32x1xf32> to vector<32x128xf32>
    %18 = arith.mulf %15, %17 : vector<32x128xf32>
    %cst_14 = arith.constant dense<0.000000e+00> : vector<128xf32>
    %19 = vector.multi_reduction <add>, %18, %cst_14 [0] : vector<32x128xf32> to vector<128xf32>
    %20 = vector.shape_cast %19 : vector<128xf32> to vector<1x128xf32>
    %c0_15 = arith.constant 0 : index
    %c0_16 = arith.constant 0 : index
    %21 = vector.load %arg7[%c0_15, %c0_16] : memref<1x1xf32, #tpu.memory_space<vmem>>, vector<1x1xf32>
    %22 = vector.broadcast %21 : vector<1x1xf32> to vector<1x128xf32>
    %23 = arith.addf %20, %22 : vector<1x128xf32>
    %24 = arith.negf %23 : vector<1x128xf32>
    %25 = math.exp %24 : vector<1x128xf32>
    %cst_17 = arith.constant 1.000000e+00 : f32
    %26 = vector.broadcast %cst_17 : f32 to vector<1x128xf32>
    %27 = arith.addf %26, %25 : vector<1x128xf32>
    %28 = arith.divf %26, %27 : vector<1x128xf32>
    %c0_18 = arith.constant 0 : index
    %c0_19 = arith.constant 0 : index
    %29 = vector.load %arg8[%c0_18, %c0_19] : memref<1x128xf32, #tpu.memory_space<vmem>>, vector<1x128xf32>
    tpu.vector_store %arg8[%c0_18, %c0_19], %28 {strides = array<i32>} : memref<1x128xf32, #tpu.memory_space<vmem>>, vector<1x128xf32>,
    return
  }
  func.func @transform_0(%arg0: i32) -> (i32, i32) {
    %c0_i32 = arith.constant 0 : i32
    %c0_i32_0 = arith.constant 0 : i32
    return %arg0, %c0_i32 : i32, i32
  }
  func.func @transform_1(%arg0: i32) -> (i32, i32) {
    %c0_i32 = arith.constant 0 : i32
    %c0_i32_0 = arith.constant 0 : i32
    %c0_i32_1 = arith.constant 0 : i32
    return %c0_i32, %c0_i32_0 : i32, i32
  }
  func.func @transform_2(%arg0: i32) -> (i32, i32) {
    %c0_i32 = arith.constant 0 : i32
    %c0_i32_0 = arith.constant 0 : i32
    %c0_i32_1 = arith.constant 0 : i32
    return %c0_i32, %c0_i32_0 : i32, i32
  }
  func.func @transform_3(%arg0: i32) -> (i32, i32) {
    %c0_i32 = arith.constant 0 : i32
    %c0_i32_0 = arith.constant 0 : i32
    %c0_i32_1 = arith.constant 0 : i32
    return %c0_i32, %c0_i32_0 : i32, i32
  }
  func.func @transform_4(%arg0: i32) -> (i32, i32) {
    %c0_i32 = arith.constant 0 : i32
    %c0_i32_0 = arith.constant 0 : i32
    %c0_i32_1 = arith.constant 0 : i32
    return %c0_i32, %c0_i32_0 : i32, i32
  }
  func.func @transform_5(%arg0: i32) -> (i32, i32) {
    %c0_i32 = arith.constant 0 : i32
    %c0_i32_0 = arith.constant 0 : i32
    %c0_i32_1 = arith.constant 0 : i32
    return %c0_i32, %c0_i32_0 : i32, i32
  }
  func.func @transform_6(%arg0: i32) -> (i32, i32) {
    %c0_i32 = arith.constant 0 : i32
    %c0_i32_0 = arith.constant 0 : i32
    %c0_i32_1 = arith.constant 0 : i32
    return %c0_i32, %c0_i32_0 : i32, i32
  }
  func.func @transform_7(%arg0: i32) -> (i32, i32) {
    %c0_i32 = arith.constant 0 : i32
    %c0_i32_0 = arith.constant 0 : i32
    return %c0_i32, %arg0 : i32, i32
  }
}

</mosaic_0001>

<bundles_post_ra>
// kernel: tpu_custom_call.1
= control target key start
LH: loop header
LB: loop body
LE: loop exit
PB: predicated region body
PF: predicated region fallthrough
CT: control target
= control target key end

     0   :  { %s1308_s0 = inlined_call_operand.vmem [shape: bf16[2,32], index: 0, kind: input, shape index: {}]   ;;  %s1309_s1 = inlined_call_operand.vmem [shape: bf16[32,32], index: 1, kind: input, shape index: {}]   ;;  %s1310_s2 = inlined_call_operand.vmem [shape: f32[32,1], index: 2, kind: input, shape index: {}]   ;;  %s1311_s3 = inlined_call_operand.vmem [shape: bf16[32,32], index: 3, kind: input, shape index: {}]   ;;  %s1312_s4 = inlined_call_operand.vmem [shape: f32[32,1], index: 4, kind: input, shape index: {}]   ;;  %s1313_s5 = inlined_call_operand.vmem [shape: f32[32,1], index: 5, kind: input, shape index: {}]   ;;  %s1314_s6 = inlined_call_operand.<no memory space> [shape: f32[1,1], index: 6, kind: input, shape index: {}]   ;;  %s1315_s7 = inlined_call_operand.hbm [shape: f32[1,2], index: 7, kind: output, shape index: {}]  }
   0x1   :  { %v12_v0 = vstv %s1314_s6 }
   0x2   :  { %13 = vst [vmem:[#allocation2] sm:$0x1] %v12_v0 }
   0x3   :  { %v30_v1 = vld [vmem:[%s1308_s0] sm:$0x1]  ;;  %v31_v2 = vld [vmem:[%s1308_s0 + $0x1] sm:$0x1]  ;;  %v32_v3 = vld [vmem:[%s1308_s0 + $0x2] sm:$0x1]  ;;  %v203_v4 = vlaneseq }
   0x4   :  { %v33_v5 = vld [vmem:[%s1308_s0 + $0x3] sm:$0x1]  ;;  %v34_v6 = vld [vmem:[%s1308_s0 + $0x4] sm:$0x1]  ;;  %v35_v7 = vld [vmem:[%s1308_s0 + $0x5] sm:$0x1]  ;;  %v196_v15 = vcombine.low %v30_v1, %v31_v2 }
   0x5   :  { %v36_v8 = vld [vmem:[%s1308_s0 + $0x6] sm:$0x1]  ;;  %v37_v9 = vld [vmem:[%s1308_s0 + $0x7] sm:$0x1]  ;;  %v936_v10 = vmov 1966171168   ;;  %v197_v19 = vcombine.low %v32_v3, %v33_v5  ;;  %v198_v20 = vcombine.low %v34_v6, %v35_v7 }
   0x6   :  { %v201_v11 = vunpack.c.l.s4 %v936_v10  ;;  %v1006_v12 = vshrl.u32 %v203_v4, 7  ;;  %v38_v13 = vld [vmem:[%s1308_s0 + $0x8] sm:$0x1]  ;;  %v39_v14 = vld [vmem:[%s1308_s0 + $0x9] sm:$0x1]  ;;  %v199_v21 = vcombine.low %v36_v8, %v37_v9  ;;  %vm588_vm0 = vcmask 261120  }
   0x7   :  { %v40_v16 = vld [vmem:[%s1308_s0 + $0xa] sm:$0x1]  ;;  %v41_v17 = vld [vmem:[%s1308_s0 + $0xb] sm:$0x1]  ;;  %v42_v18 = vld [vmem:[%s1308_s0 + $0xc] sm:$0x1]  ;;  %v245_v26 = vcombine.low %v38_v13, %v39_v14 }
   0x8   :  { %v202_v22 = vunpack.c.0.s8 %v201_v11  ;;  %v43_v23 = vld [vmem:[%s1308_s0 + $0xd] sm:$0x1]  ;;  %v44_v24 = vld [vmem:[%s1308_s0 + $0xe] sm:$0x1]  ;;  %v45_v25 = vld [vmem:[%s1308_s0 + $0xf] sm:$0x1]  ;;  %v246_v27 = vcombine.low %v40_v16, %v41_v17 }
   0x9   :  { %v247_v28 = vcombine.low %v42_v18, %v43_v23  ;;  %v248_v29 = vcombine.low %v44_v24, %v45_v25  ;;  %v46_v30 = vld [vmem:[%s1308_s0 + $0x10] sm:$0x1]  ;;  %v47_v31 = vld [vmem:[%s1308_s0 + $0x11] sm:$0x1]  ;;  %v48_v32 = vld [vmem:[%s1308_s0 + $0x12] sm:$0x1] }
   0xa   :  { %v1042_v33 = vsub.s32 %v202_v22, %v1006_v12  ;;  %v49_v34 = vld [vmem:[%s1308_s0 + $0x13] sm:$0x1]  ;;  %v50_v35 = vld [vmem:[%s1308_s0 + $0x14] sm:$0x1]  ;;  %v51_v36 = vld [vmem:[%s1308_s0 + $0x15] sm:$0x1]  ;;  %v294_v37 = vcombine.low %v46_v30, %v47_v31 }
   0xb   :  { %v52_v38 = vld [vmem:[%s1308_s0 + $0x16] sm:$0x1]  ;;  %v53_v39 = vld [vmem:[%s1308_s0 + $0x17] sm:$0x1]  ;;  %v295_v40 = vcombine.low %v48_v32, %v49_v34  ;;  %v296_v41 = vcombine.low %v50_v35, %v51_v36  ;;  %v54_v50 = vld [vmem:[%s1308_s0 + $0x18] sm:$0x1] }
   0xc   :  { %v206_v42 = vrot.slane %v196_v15, %v1042_v33  ;;  %v213_v43 = vrot.slane %v197_v19, %v1042_v33  ;;  %v220_v44 = vrot.slane %v198_v20, %v1042_v33  ;;  %v227_v45 = vrot.slane %v199_v21, %v1042_v33  ;;  %v55_v51 = vld [vmem:[%s1308_s0 + $0x19] sm:$0x1]  ;;  %v56_v56 = vld [vmem:[%s1308_s0 + $0x1a] sm:$0x1]  ;;  %v57_v57 = vld [vmem:[%s1308_s0 + $0x1b] sm:$0x1] }
   0xd   :  { %v255_v46 = vrot.slane %v245_v26, %v1042_v33  ;;  %v262_v47 = vrot.slane %v246_v27, %v1042_v33  ;;  %v269_v48 = vrot.slane %v247_v28, %v1042_v33  ;;  %v276_v49 = vrot.slane %v248_v29, %v1042_v33  ;;  %v58_v58 = vld [vmem:[%s1308_s0 + $0x1c] sm:$0x1]  ;;  %v59_v63 = vld [vmem:[%s1308_s0 + $0x1d] sm:$0x1]  ;;  %v60_v0 = vld [vmem:[%s1308_s0 + $0x1e] sm:$0x1] }
   0xe   :  { %v228_v52 = vcombine.low %v206_v42, %v213_v43  ;;  %v229_v53 = vcombine.low %v220_v44, %v227_v45  ;;  %v297_v54 = vcombine.low %v52_v38, %v53_v39  ;;  %v304_v55 = vrot.slane %v294_v37, %v1042_v33  ;;  %v61_v1 = vld [vmem:[%s1308_s0 + $0x1f] sm:$0x1]  ;;  %v904_v17 = vld [vmem:[%s1309_s1] sm:$0xff]   ;;  %v71_v44 = vld [vmem:[%s1308_s0 + $0x29] sm:$0x1] }
   0xf   :  { %v277_v59 = vcombine.low %v255_v46, %v262_v47  ;;  %v278_v60 = vcombine.low %v269_v48, %v276_v49  ;;  %v311_v61 = vrot.slane %v295_v40, %v1042_v33  ;;  %v318_v62 = vrot.slane %v296_v41, %v1042_v33  ;;  %v62_v20 = vld [vmem:[%s1308_s0 + $0x20] sm:$0x1]  ;;  %v63_v21 = vld [vmem:[%s1308_s0 + $0x21] sm:$0x1]  ;;  %v64_v26 = vld [vmem:[%s1308_s0 + $0x22] sm:$0x1]  ;;  %879 = vmatprep.mubr.msk.bf16.mxu0 %vm588_vm0, %v904_v17 }
  0x10   :  { %v236_v2 = vrot.slane %v228_v52, %v1042_v33  ;;  %v243_v3 = vrot.slane %v229_v53, %v1042_v33  ;;  %v325_v4 = vrot.slane %v297_v54, %v1042_v33  ;;  %v343_v5 = vcombine.low %v54_v50, %v55_v51  ;;  %v65_v27 = vld [vmem:[%s1308_s0 + $0x23] sm:$0x1]  ;;  %v66_v28 = vld [vmem:[%s1308_s0 + $0x24] sm:$0x1]  ;;  %v67_v29 = vld [vmem:[%s1308_s0 + $0x25] sm:$0x1] }
  0x11   :  { %v285_v6 = vrot.slane %v277_v59, %v1042_v33  ;;  %v292_v7 = vrot.slane %v278_v60, %v1042_v33  ;;  %v326_v8 = vcombine.low %v304_v55, %v311_v61  ;;  %v344_v9 = vcombine.low %v56_v56, %v57_v57  ;;  %v68_v30 = vld [vmem:[%s1308_s0 + $0x26] sm:$0x1]  ;;  %v69_v31 = vld [vmem:[%s1308_s0 + $0x27] sm:$0x1]  ;;  %v70_v41 = vld [vmem:[%s1308_s0 + $0x28] sm:$0x1] }
  0x12   :  { %v244_v10 = vcombine.low %v236_v2, %v243_v3  ;;  %v327_v11 = vcombine.low %v318_v62, %v325_v4  ;;  %v345_v13 = vcombine.low %v58_v58, %v59_v63  ;;  %v346_v14 = vcombine.low %v60_v0, %v61_v1  ;;  %v72_v45 = vld [vmem:[%s1308_s0 + $0x2a] sm:$0x1]  ;;  %v73_v46 = vld [vmem:[%s1308_s0 + $0x2b] sm:$0x1]  ;;  %v74_v51 = vld [vmem:[%s1308_s0 + $0x2c] sm:$0x1] }
  0x13   :  { %v293_v15 = vcombine.low %v285_v6, %v292_v7  ;;  %v353_v18 = vrot.slane %v343_v5, %v1042_v33  ;;  %v360_v19 = vrot.slane %v344_v9, %v1042_v33  ;;  %v334_v22 = vrot.slane %v326_v8, %v1042_v33  ;;  %v75_v52 = vld [vmem:[%s1308_s0 + $0x2d] sm:$0x1]  ;;  %v76_v53 = vld [vmem:[%s1308_s0 + $0x2e] sm:$0x1]  ;;  %v77_v54 = vld [vmem:[%s1308_s0 + $0x2f] sm:$0x1] }
  0x14   :  { %891 = vmatprep.subr.msk.bf16.mxu0 %vm588_vm0, %v244_v10  ;;  %v596_v16 = vsel %vm588_vm0, %v244_v10, 0  ;;  %v341_v23 = vrot.slane %v327_v11, %v1042_v33  ;;  %v367_v24 = vrot.slane %v345_v13, %v1042_v33  ;;  %v374_v25 = vrot.slane %v346_v14, %v1042_v33  ;;  %v98_v60 = vld [vmem:[%s1310_s2] sm:$0xff]  ;;  %v100_v61 = vld [vmem:[%s1310_s2 + $0x10] sm:$0xff] }
  0x15   :  { %864 = vmatpush3.bf16.xpose.msra.mxu0 %v596_v16  ;;  %v599_v32 = vsel %vm588_vm0, %v293_v15, 0  ;;  %v375_v34 = vcombine.low %v353_v18, %v360_v19  ;;  %v392_v35 = vcombine.low %v62_v20, %v63_v21  ;;  %v393_v36 = vcombine.low %v64_v26, %v65_v27 }
  0x16   :  { %892 = vmatprep.subr.msk.bf16.mxu0 %vm588_vm0, %v293_v15  ;;  %v342_v37 = vcombine.low %v334_v22, %v341_v23  ;;  %v376_v38 = vcombine.low %v367_v24, %v374_v25  ;;  %v394_v39 = vcombine.low %v66_v28, %v67_v29  ;;  %v395_v40 = vcombine.low %v68_v30, %v69_v31 }
  0x17   :  { %v402_v42 = vrot.slane %v392_v35, %v1042_v33  ;;  %v409_v43 = vrot.slane %v393_v36, %v1042_v33  ;;  %v383_v47 = vrot.slane %v375_v34, %v1042_v33  ;;  %v441_v55 = vcombine.low %v70_v41, %v71_v44 }
  0x18   :  { %v390_v48 = vrot.slane %v376_v38, %v1042_v33  ;;  %v416_v49 = vrot.slane %v394_v39, %v1042_v33  ;;  %v423_v50 = vrot.slane %v395_v40, %v1042_v33  ;;  %v602_v56 = vsel %vm588_vm0, %v342_v37, 0 }
  0x19   :  { %v424_v57 = vcombine.low %v402_v42, %v409_v43  ;;  %v442_v58 = vcombine.low %v72_v45, %v73_v46  ;;  %v443_v59 = vcombine.low %v74_v51, %v75_v52 }
  0x1d   :  { %866 = vmatpush3.bf16.xpose.msra.mxu0 %v599_v32 }
  0x1e   :  { %893 = vmatprep.subr.msk.bf16.mxu0 %vm588_vm0, %v342_v37 }
  0x1f   :  { %14 = vsyncpa [#allocation4], 0  ;;  %v391_v62 = vcombine.low %v383_v47, %v390_v48  ;;  %v425_v63 = vcombine.low %v416_v49, %v423_v50  ;;  %v444_v0 = vcombine.low %v76_v53, %v77_v54  ;;  %v937_v1 = vmov 0   ;;  %v78_v2 = vld [vmem:[%s1308_s0 + $0x30] sm:$0x1]  ;;  %v99_v7 = vld [vmem:[%s1310_s2 + $0x8] sm:$0xff] }
  0x20   :  { %902 = vset.pattern.permute.xlu0 %v937_v1  ;;  %903 = vset.pattern.permute.xlu1 %v937_v1  ;;  %v79_v3 = vld [vmem:[%s1308_s0 + $0x31] sm:$0x1]  ;;  %v432_v4 = vrot.slane %v424_v57, %v1042_v33  ;;  %v451_v5 = vrot.slane %v441_v55, %v1042_v33  ;;  %v80_v6 = vld [vmem:[%s1308_s0 + $0x32] sm:$0x1]  ;;  %v101_v8 = vld [vmem:[%s1310_s2 + $0x18] sm:$0xff]  ;;  %v458_v10 = vrot.slane %v442_v58, %v1042_v33 }
  0x21   :  { %104 = vperm.xlu0 %902, %v98_v60   ;;  %114 = vperm.xlu1 %903, %v100_v61   ;;  %v439_v9 = vrot.slane %v425_v63, %v1042_v33  ;;  %v465_v11 = vrot.slane %v443_v59, %v1042_v33  ;;  %v472_v13 = vrot.slane %v444_v0, %v1042_v33  ;;  %v81_v14 = vld [vmem:[%s1308_s0 + $0x33] sm:$0x1]  ;;  %v82_v15 = vld [vmem:[%s1308_s0 + $0x34] sm:$0x1]  ;;  %v83_v16 = vld [vmem:[%s1308_s0 + $0x35] sm:$0x1] }
  0x22   :  { %v84_v17 = vld [vmem:[%s1308_s0 + $0x36] sm:$0x1]  ;;  %v85_v18 = vld [vmem:[%s1308_s0 + $0x37] sm:$0x1]  ;;  %v605_v19 = vsel %vm588_vm0, %v391_v62, 0  ;;  %v490_v20 = vcombine.low %v78_v2, %v79_v3  ;;  %v491_v21 = vcombine.low %v80_v6, %v81_v14  ;;  %v492_v22 = vcombine.low %v82_v15, %v83_v16  ;;  %v678_v23 = vld [vmem:[%s1312_s4] sm:$0xff] }
  0x23   :  { %v679_v24 = vld [vmem:[%s1312_s4 + $0x8] sm:$0xff]  ;;  %v440_v25 = vcombine.low %v432_v4, %v439_v9  ;;  %v473_v26 = vcombine.low %v451_v5, %v458_v10  ;;  %v474_v27 = vcombine.low %v465_v11, %v472_v13  ;;  %v493_v28 = vcombine.low %v84_v17, %v85_v18  ;;  %v86_v29 = vld [vmem:[%s1308_s0 + $0x38] sm:$0x1]  ;;  %v87_v32 = vld [vmem:[%s1308_s0 + $0x39] sm:$0x1] }
  0x24   :  { %v500_v30 = vrot.slane %v490_v20, %v1042_v33  ;;  %v507_v31 = vrot.slane %v491_v21, %v1042_v33  ;;  %v680_v34 = vld [vmem:[%s1312_s4 + $0x10] sm:$0xff]  ;;  %v681_v35 = vld [vmem:[%s1312_s4 + $0x18] sm:$0xff]  ;;  %v514_v38 = vrot.slane %v492_v22, %v1042_v33  ;;  %v539_v48 = vcombine.low %v86_v29, %v87_v32  ;;  %v771_v50 = vld [vmem:[%s1313_s5] sm:$0xff] }
  0x25   :  { %868 = vmatpush3.bf16.xpose.msra.mxu0 %v602_v56  ;;  %109 = vperm.xlu0 %902, %v99_v7   ;;  %v481_v36 = vrot.slane %v473_v26, %v1042_v33  ;;  %v488_v37 = vrot.slane %v474_v27, %v1042_v33  ;;  %v521_v39 = vrot.slane %v493_v28, %v1042_v33  ;;  %v88_v40 = vld [vmem:[%s1308_s0 + $0x3a] sm:$0x1]  ;;  %v89_v41 = vld [vmem:[%s1308_s0 + $0x3b] sm:$0x1]  ;;  %v90_v42 = vld [vmem:[%s1308_s0 + $0x3c] sm:$0x1] }
  0x26   :  { %894 = vmatprep.subr.msk.bf16.mxu0 %vm588_vm0, %v391_v62  ;;  %119 = vperm.xlu1 %903, %v101_v8   ;;  %v91_v43 = vld [vmem:[%s1308_s0 + $0x3d] sm:$0x1]  ;;  %v92_v44 = vld [vmem:[%s1308_s0 + $0x3e] sm:$0x1]  ;;  %v93_v45 = vld [vmem:[%s1308_s0 + $0x3f] sm:$0x1]  ;;  %v522_v47 = vcombine.low %v500_v30, %v507_v31  ;;  %v540_v49 = vcombine.low %v88_v40, %v89_v41  ;;  %v549_v56 = vrot.slane %v539_v48, %v1042_v33 }
  0x27   :  { %v608_v46 = vsel %vm588_vm0, %v440_v25, 0  ;;  %v772_v51 = vld [vmem:[%s1313_s5 + $0x8] sm:$0xff]  ;;  %v489_v52 = vcombine.low %v481_v36, %v488_v37  ;;  %v523_v53 = vcombine.low %v514_v38, %v521_v39  ;;  %v541_v54 = vcombine.low %v90_v42, %v91_v43  ;;  %v773_v58 = vld [vmem:[%s1313_s5 + $0x10] sm:$0xff]  ;;  %v774_v59 = vld [vmem:[%s1313_s5 + $0x18] sm:$0xff] }
  0x28   :  { %v542_v55 = vcombine.low %v92_v44, %v93_v45  ;;  %v556_v57 = vrot.slane %v540_v49, %v1042_v33  ;;  %v530_v60 = vrot.slane %v522_v47, %v1042_v33  ;;  %v808_v0 = vld [vmem:[#allocation2] sm:$0x1]  ;;  %v905_v10 = vld [vmem:[%s1309_s1 + $0x8] sm:$0xff]  }
  0x29   :  { %684 = vperm.xlu0 %902, %v678_v23   ;;  %v537_v61 = vrot.slane %v523_v53, %v1042_v33  ;;  %v563_v62 = vrot.slane %v541_v54, %v1042_v33  ;;  %v611_v1 = vsel %vm588_vm0, %v489_v52, 0  ;;  %v906_v11 = vld [vmem:[%s1311_s3] sm:$0xff]   ;;  %v907_v30 = vld [vmem:[%s1311_s3 + $0x8] sm:$0xff]   ;;  %s938_s3 = smov [#allocation3]  }
  0x2a   :  { %689 = vperm.xlu1 %903, %v679_v24   ;;  %v570_v63 = vrot.slane %v542_v55, %v1042_v33  ;;  %v571_v3 = vcombine.low %v549_v56, %v556_v57  ;;  %887 = vmatprep.mubr.msk.bf16.mxu1 %vm588_vm0, %v906_v11  ;;  %s832_s12 = sshll.u32 %s938_s3, 4  ;;  %s833_s12 = int_to_ptr.vmem [resolvable:$true] %s832_s12 }
  0x2b   :  { %v538_v2 = vcombine.low %v530_v60, %v537_v61  ;;  %s912_s13 = scalar_lea.vmem %s833_s12, 16  ;;  %s916_s14 = scalar_lea.vmem %s833_s12, 32 }
  0x2c   :  { %v572_v4 = vcombine.low %v563_v62, %v570_v63  ;;  %v579_v5 = vrot.slane %v571_v3, %v1042_v33  ;;  %v816_v62 = vsub.s32 0, %v1006_v12  ;;  %p913_p0 = scmp.ne.s32.totalorder %s833_s12, %s912_s13  ;;  %p917_p1 = scmp.lt.s32.totalorder %s833_s12, %s833_s12 }
  0x2d   :  { %870 = vmatpush3.bf16.xpose.msra.mxu0 %v605_v19  ;;  %694 = vperm.xlu0 %902, %v680_v34   ;;  %v614_v7 = vsel %vm588_vm0, %v538_v2, 0  ;;  %p918_p2 = scmp.lt.s32.totalorder %s916_s14, %s912_s13 }
  0x2e   :  { %895 = vmatprep.subr.msk.bf16.mxu0 %vm588_vm0, %v440_v25  ;;  %699 = vperm.xlu1 %903, %v681_v35   ;;  %v586_v6 = vrot.slane %v572_v4, %v1042_v33 }
  0x2f   :  { %p919_p3 = por %p918_p2, %p917_p1 }
  0x30   :  { %v587_v8 = vcombine.low %v579_v5, %v586_v6 }
  0x31   :  { %777 = vperm.xlu0 %902, %v771_v50   ;;  %p920_p4 = pnand %p919_p3, %p913_p0 }
  0x32   :  { %782 = vperm.xlu1 %903, %v772_v51   ;;  %v617_v9 = vsel %vm588_vm0, %v587_v8, 0 }
  0x35   :  { %872 = vmatpush3.bf16.xpose.msra.mxu0 %v608_v46  ;;  %787 = vperm.xlu0 %902, %v773_v58  }
  0x36   :  { %896 = vmatprep.subr.msk.bf16.mxu0 %vm588_vm0, %v489_v52  ;;  %792 = vperm.xlu1 %903, %v774_v59  }
  0x39   :  { %811 = vperm.xlu0 %902, %v808_v0  }
  0x3d   :  { %874 = vmatpush3.bf16.xpose.msra.mxu0 %v611_v1 }
  0x3e   :  { %897 = vmatprep.subr.msk.bf16.mxu0 %vm588_vm0, %v538_v2 }
  0x45   :  { %876 = vmatpush3.bf16.xpose.msra.mxu0 %v614_v7 }
  0x46   :  { %898 = vmatprep.subr.msk.bf16.mxu0 %vm588_vm0, %v587_v8 }
  0x4d   :  { %878 = vmatpush3.bf16.xpose.msra.mxu0 %v617_v9 }
  0x54   :  { %880 = vmatmul.mubr.msk.bf16.vlgmr.msra.gmra.mrb[0].mxu0 %vm588_vm0, %v905_v10 }
  0xa0   :  { %v115_v33 = vpop.permute.xlu1 %114  ;;  %v105_v13 = vpop.permute.xlu0 %104 }
  0xa4   :  { %v110_v20 = vpop.permute.xlu0 %109 }
  0xa5   :  { %v120_v17 = vpop.permute.xlu1 %119 }
  0xa8   :  { %v685_v31 = vpop.permute.xlu0 %684 }
  0xa9   :  { %v690_v32 = vpop.permute.xlu1 %689 }
  0xac   :  { %v695_v34 = vpop.permute.xlu0 %694 }
  0xad   :  { %v700_v35 = vpop.permute.xlu1 %699 }
  0xb0   :  { %v778_v41 = vpop.permute.xlu0 %777 }
  0xb1   :  { %v783_v46 = vpop.permute.xlu1 %782 }
  0xb4   :  { %v788_v52 = vpop.permute.xlu0 %787 }
  0xb5   :  { %v793_v55 = vpop.permute.xlu1 %792 }
  0xb8   :  { %v812_v0 = vpop.permute.xlu0 %811 }
  0xb9   :  { %v817_v2 = vrot.slane %v812_v0, %v816_v62 }
 0x127   :  { %v881_v14 = vpop.f32.mrb[0].mxu0 }
 0x128   :  { %v662_v15 = vadd.f32 %v881_v14, %v115_v33  ;;  %v653_v16 = vpop.f32.mrb[1].mxu0 }
 0x129   :  { %v654_v18 = vadd.f32 %v653_v16, %v105_v13  ;;  %v882_v19 = vpop.f32.mrb[2].mxu0 }
 0x12a   :  { %v665_v21 = vadd.f32 %v882_v19, %v120_v17  ;;  %v656_v22 = vpop.f32.mrb[3].mxu0  ;;  %v670_v24 = vmax.f32 %v662_v15, 0.0 }
 0x12b   :  { %v657_v23 = vadd.f32 %v656_v22, %v110_v20  ;;  %v668_v26 = vmax.f32 %v654_v18, 0.0 }
 0x12c   :  { %v671_v25 = vmax.f32 %v665_v21, 0.0 }
 0x12d   :  { %v669_v27 = vmax.f32 %v657_v23, 0.0 }
 0x12e   :  { %v677_v28 = vpack.c.bf16 %v671_v25, %v670_v24 }
 0x12f   :  { %v676_v29 = vpack.c.bf16 %v669_v27, %v668_v26 }
 0x131   :  { %883 = vmatprep.subr.bf16.mxu1 %v676_v29 }
 0x132   :  { %884 = vmatpush3.bf16.msra.mxu1 %v676_v29 }
 0x133   :  { %885 = vmatprep.subr.bf16.mxu1 %v677_v28 }
 0x136   :  { %886 = vmatpush3.bf16.msra.mxu1 %v677_v28 }
 0x139   :  { %888 = vmatmul.mubr.msk.bf16.vlgmr.msra.gmra.mrb[0].mxu1 %vm588_vm0, %v907_v30 }
 0x20c   :  { %v889_v36 = vpop.f32.mrb[0].mxu1 }
 0x20d   :  { %v752_v37 = vpop.f32.mrb[1].mxu1  ;;  %v761_v38 = vadd.f32 %v889_v36, %v695_v34 }
 0x20e   :  { %v753_v39 = vadd.f32 %v752_v37, %v685_v31  ;;  %v890_v40 = vpop.f32.mrb[2].mxu1 }
 0x20f   :  { %v755_v42 = vpop.f32.mrb[3].mxu1  ;;  %v764_v44 = vadd.f32 %v890_v40, %v700_v35  ;;  %v769_v47 = vmax.f32 %v761_v38, 0.0 }
 0x210   :  { %v767_v43 = vmax.f32 %v753_v39, 0.0  ;;  %v756_v45 = vadd.f32 %v755_v42, %v690_v32 }
 0x211   :  { %v770_v50 = vmax.f32 %v764_v44, 0.0  ;;  %v797_v53 = vmul.f32 %v788_v52, %v769_v47 }
 0x212   :  { %v768_v48 = vmax.f32 %v756_v45, 0.0  ;;  %v795_v49 = vmul.f32 %v778_v41, %v767_v43 }
 0x213   :  { %v798_v56 = vmul.f32 %v793_v55, %v770_v50 }
 0x214   :  { %v796_v51 = vmul.f32 %v783_v46, %v768_v48 }
 0x216   :  { %v799_v54 = vadd.f32 %v796_v51, %v795_v49 }
 0x218   :  { %v800_v57 = vadd.f32 %v799_v54, %v797_v53 }
 0x21a   :  { %v801_v58 = vadd.f32 %v800_v57, %v798_v56 }
 0x21c   :  { %v802_v59 = vrot.slane %v801_v58, 4 }
 0x21e   :  { %v803_v60 = vadd.f32 %v802_v59, %v801_v58 }
 0x220   :  { %v804_v61 = vrot.slane %v803_v60, 2 }
 0x222   :  { %v805_v63 = vadd.f32 %v804_v61, %v803_v60 }
 0x224   :  { %v806_v1 = vrot.slane %v805_v63, 1 }
 0x226   :  { %v807_v3 = vadd.f32 %v806_v1, %v805_v63 }
 0x228   :  { %v818_v4 = vadd.f32 %v817_v2, %v807_v3 }
 0x22a   :  { %v848_v5 = vmul.f32 -1.442695, %v818_v4 }
 0x22c   :  { %908 = vpow2.f32 %v848_v5 }
 0x236   :  { %v909_v6 = vpop.eup %908 }
 0x237   :  { %v822_v7 = vadd.f32 1.0, %v909_v6 }
 0x239   :  { %910 = vrcp.f32 %v822_v7 }
 0x243   :  { %v911_v8 = vpop.eup %910 }
 0x244   :  { %825 = vst [vmem:[#allocation3] sm:$0x1] %v911_v8 }
 0x245   :  { %923 = shalt.err (!%p920_p4)
}
 0x246   :  { %s924_s17 = scalar_lea.hbm %s1315_s7, 16 }
 0x247   :  { %p925_p5 = scmp.ne.s32.totalorder %s1315_s7, %s924_s17  ;;  %p928_p6 = scmp.lt.u32.totalorder %s924_s17, %s1315_s7 }
 0x249   :  { %p930_p7 = pnand %p928_p6, %p925_p5 }
 0x24b   :  { %933 = shalt.err (!%p930_p7)
}
 0x24c   :  { %835 = dma.vmem_to_hbm [thread:$0]  %s833_s12, 16, %s1315_s7, [#allocation4]  }
 0x24d   :  { %934 = dma.done.wait [#allocation4], 16  }
 0x24e   :  { %935 = vsyncadd [#allocation4], 4294967280 }
 0x24f   :  { %839 = vsyncpa [#allocation4], 1 }

</bundles_post_ra>
